<compile_context>
chip_gen: v7x
topology: tpu7x:2x2x1
jax: 0.10.0
libtpu: 0.0.40
codegen_flags: <defaults>
</compile_context>

<pallas_src>
import jax
import jax.numpy as jnp
from jax import lax
from jax.experimental import pallas as pl
from jax.experimental.pallas import tpu as pltpu


def _mlp_kernel(x_ref, w12_ref, b12_ref, w3_ref, b3_ref, out_ref):
    """One batch tile.

    x_ref  : (TM, input_size)  batch-major x tile (batch on sublanes)
    w12_ref: (H2, input_size)  folded W2 @ W1
    b12_ref: (H2, 1)           folded W2 @ b1 + b2
    w3_ref : (1, H2)           final layer weight (PyTorch nn.Linear layout)
    b3_ref : (1, 1)
    out_ref: (1, TM)           batch on lanes -> lane-dense stores
    """
    # Fused Linear1+Linear2 with the batch relayout done by the MXU: contract input_size
    # (the LAST axis of BOTH operands) -> (H2, TM) with batch on the lane axis.
    h = lax.dot_general(
        w12_ref[...], x_ref[...],
        dimension_numbers=(((1,), (1,)), ((), ())),
        preferred_element_type=jnp.float32,
    )
    h = jnp.maximum(h + b12_ref[...], 0.0)            # bias + ReLU on the VPU
    # Final Linear(H2 -> 1) on the MXU: (1, H2) @ (H2, TM) -> (1, TM), lane-dense output.
    y = jnp.dot(w3_ref[...], h, preferred_element_type=jnp.float32) + b3_ref[...]
    out_ref[...] = y


def _round_up(n, m):
    return pl.cdiv(n, m) * m


def flexible_regressor_forward(x, params, tile_lanes=16384):
    """x: (batch, input_size) f32. Returns (batch,) f32, matching FlexibleRegressor.forward."""
    assert x.ndim == 2, "expected (batch, input_size)"
    batch, input_size = x.shape
    w1, b1 = params["w1"], params["b1"]        # (H1, in), (H1,)
    w2, b2 = params["w2"], params["b2"]        # (H2, H1), (H2,)
    w3, b3 = params["w3"], params["b3"]        # (1, H2),  (1,)
    h2 = w2.shape[0]

    # Fold the activation-free first two Linears:
    #   x @ W1^T @ W2^T + (b1 @ W2^T + b2)  ==  x @ W12^T + b12
    w12 = jnp.dot(w2, w1, preferred_element_type=jnp.float32)            # (H2, in)
    b12 = (jnp.dot(w2, b1[:, None]) + b2[:, None]).astype(jnp.float32)   # (H2, 1)
    w3_row = w3.reshape(1, h2).astype(jnp.float32)                       # (1, H2)
    b3_11 = b3.reshape(1, 1).astype(jnp.float32)                         # (1, 1)

    # Batch tile: always a multiple of 128 lanes (correctness), clamped so the grid keeps
    # >= 2 steps when the batch allows (v7x megacore), no padding copy of x (cdiv grid).
    tile_lanes = max(128, (int(tile_lanes) // 128) * 128)
    padded = _round_up(batch, 128)
    tm = min(tile_lanes, padded)
    if padded > 128:
        tm = min(tm, _round_up(pl.cdiv(padded, 2), 128))
    grid = (pl.cdiv(batch, tm),)

    resident = lambda shape: pl.BlockSpec(shape, lambda i: (0, 0))  # VMEM-resident weights

    out = pl.pallas_call(
        _mlp_kernel,
        out_shape=jax.ShapeDtypeStruct((1, batch), jnp.float32),
        grid=grid,
        in_specs=[
            pl.BlockSpec((tm, input_size), lambda i: (i, 0)),   # streamed batch-major x tile
            resident((h2, input_size)),                         # W12
            resident((h2, 1)),                                  # b12
            resident((1, h2)),                                  # w3
            resident((1, 1)),                                   # b3
        ],
        out_specs=pl.BlockSpec((1, tm), lambda i: (0, i)),
        compiler_params=pltpu.CompilerParams(
            dimension_semantics=("parallel",),        # batch steps shard across v7x's 2 TCs
            vmem_limit_bytes=40 * 1024 * 1024,        # (TM,16) blocks lane-pad 16->128 in VMEM
        ),
    )(x, w12, b12, w3_row, b3_11)

    # PyTorch: .squeeze(1) -> (batch,)
    return out[0]


def init_params(key, input_size, hidden_layers):
    """PyTorch-like nn.Linear init: U(-1/sqrt(fan_in), +1/sqrt(fan_in)); weights (out, in)."""
    h1, h2 = hidden_layers
    ks = jax.random.split(key, 6)

    def lin(kw, kb, fan_in, fan_out):
        bound = 1.0 / float(fan_in) ** 0.5
        w = jax.random.uniform(kw, (fan_out, fan_in), jnp.float32, -bound, bound)
        b = jax.random.uniform(kb, (fan_out,), jnp.float32, -bound, bound)
        return w, b

    w1, b1 = lin(ks[0], ks[1], input_size, h1)
    w2, b2 = lin(ks[2], ks[3], h1, h2)
    w3, b3 = lin(ks[4], ks[5], h2, 1)
    return {"w1": w1, "b1": b1, "w2": w2, "b2": b2, "w3": w3, "b3": b3}


def _ref_forward(x, params):
    """Pure-JAX reference matching the PyTorch module (unfolded layers)."""
    h = x @ params["w1"].T + params["b1"]
    h = jnp.maximum(h @ params["w2"].T + params["b2"], 0.0)
    y = h @ params["w3"].T + params["b3"]
    return y[:, 0]


if __name__ == "__main__":
    key = jax.random.PRNGKey(0)
    input_size = 16
    hidden_layers = [32, 32]

    k_param, k_x1, k_x2, k_x3 = jax.random.split(key, 4)
    params = init_params(k_param, input_size, hidden_layers)

    # Small single-tile case (batch < 128: one clipped edge block, no padding copy).
    x_small = jax.random.normal(k_x1, (8, input_size), dtype=jnp.float32)
    y_small = jax.block_until_ready(flexible_regressor_forward(x_small, params))
    assert y_small.shape == (8,)
    assert jnp.allclose(y_small, _ref_forward(x_small, params), atol=1e-4, rtol=1e-4)

    # Multi-tile ragged case: grid > 1 plus a clipped edge block (tests OOB-lane masking).
    x_multi = jax.random.normal(k_x2, (257, input_size), dtype=jnp.float32)
    y_multi = jax.block_until_ready(
        flexible_regressor_forward(x_multi, params, tile_lanes=256))
    assert y_multi.shape == (257,)
    assert jnp.allclose(y_multi, _ref_forward(x_multi, params), atol=1e-4, rtol=1e-4)

    # Non-multiple-of-128 tile_lanes gets rounded down to a legal lane tile.
    x_odd = jax.random.normal(k_x3, (300, input_size), dtype=jnp.float32)
    y_odd = jax.block_until_ready(
        flexible_regressor_forward(x_odd, params, tile_lanes=1000))
    assert y_odd.shape == (300,)
    assert jnp.allclose(y_odd, _ref_forward(x_odd, params), atol=1e-4, rtol=1e-4)

    # TODO(synk): the hidden_layers=None (single Linear) and >2-hidden-layer configurations
    # of the PyTorch module are not exercised here; only the [H1, H2] MLP path is implemented.
    print("KERNEL_OK")
</pallas_src>

<mosaic_0001>
module attributes {stable_mosaic.version = 11 : i64} {
  func.func @_mlp_kernel(%arg0: i32, %arg1: memref<128x16xf32, #tpu.memory_space<vmem>>, %arg2: memref<32x16xf32, #tpu.memory_space<vmem>>, %arg3: memref<32x1xf32, #tpu.memory_space<vmem>>, %arg4: memref<1x32xf32, #tpu.memory_space<vmem>>, %arg5: memref<1x1xf32, #tpu.memory_space<vmem>>, %arg6: memref<1x128xf32, #tpu.memory_space<vmem>>) attributes {dimension_semantics = [#tpu.dimension_semantics<parallel>], iteration_bounds = array<i64: 1>, scalar_prefetch = 0 : i64, scratch_operands = 0 : i64, tpu.core_type = #tpu.core_type<tc>, window_params = [{transform_indices = @transform_0, window_bounds = array<i64: 128, 16>}, {pipeline_mode = #tpu.pipeline_mode<synchronous>, transform_indices = @transform_1, window_bounds = array<i64: 32, 16>}, {pipeline_mode = #tpu.pipeline_mode<synchronous>, transform_indices = @transform_2, window_bounds = array<i64: 32, 1>}, {pipeline_mode = #tpu.pipeline_mode<synchronous>, transform_indices = @transform_3, window_bounds = array<i64: 1, 32>}, {pipeline_mode = #tpu.pipeline_mode<synchronous>, transform_indices = @transform_4, window_bounds = array<i64: 1, 1>}, {transform_indices = @transform_5, window_bounds = array<i64: 1, 128>}]} {
    %c0 = arith.constant 0 : index
    %c0_0 = arith.constant 0 : index
    %0 = vector.load %arg2[%c0, %c0_0] : memref<32x16xf32, #tpu.memory_space<vmem>>, vector<32x16xf32>
    %c0_1 = arith.constant 0 : index
    %c0_2 = arith.constant 0 : index
    %1 = vector.load %arg1[%c0_1, %c0_2] : memref<128x16xf32, #tpu.memory_space<vmem>>, vector<128x16xf32>
    %cst = arith.constant dense<0.000000e+00> : vector<32x128xf32>
    %2 = tpu.matmul %0, %1, %cst {dimension_numbers = #tpu.dot_dimension_numbers<[1], [1], [0], [0], [0, 0, 1, 0], [], []>} : vector<32x16xf32>, vector<128x16xf32>, vector<32x128xf32> -> vector<32x128xf32>
    %c0_3 = arith.constant 0 : index
    %c0_4 = arith.constant 0 : index
    %3 = vector.load %arg3[%c0_3, %c0_4] : memref<32x1xf32, #tpu.memory_space<vmem>>, vector<32x1xf32>
    %4 = vector.broadcast %3 : vector<32x1xf32> to vector<32x128xf32>
    %5 = arith.addf %2, %4 : vector<32x128xf32>
    %cst_5 = arith.constant 0.000000e+00 : f32
    %6 = vector.broadcast %cst_5 : f32 to vector<32x128xf32>
    %7 = arith.maximumf %5, %6 : vector<32x128xf32>
    %c0_6 = arith.constant 0 : index
    %c0_7 = arith.constant 0 : index
    %8 = vector.load %arg4[%c0_6, %c0_7] : memref<1x32xf32, #tpu.memory_space<vmem>>, vector<1x32xf32>
    %cst_8 = arith.constant dense<0.000000e+00> : vector<1x128xf32>
    %9 = tpu.matmul %8, %7, %cst_8 {dimension_numbers = #tpu.dot_dimension_numbers<[1], [0], [0], [1], [0, 0, 1, 1], [], []>} : vector<1x32xf32>, vector<32x128xf32>, vector<1x128xf32> -> vector<1x128xf32>
    %c0_9 = arith.constant 0 : index
    %c0_10 = arith.constant 0 : index
    %10 = vector.load %arg5[%c0_9, %c0_10] : memref<1x1xf32, #tpu.memory_space<vmem>>, vector<1x1xf32>
    %11 = vector.broadcast %10 : vector<1x1xf32> to vector<1x128xf32>
    %12 = arith.addf %9, %11 : vector<1x128xf32>
    %c0_11 = arith.constant 0 : index
    %c0_12 = arith.constant 0 : index
    %13 = vector.load %arg6[%c0_11, %c0_12] : memref<1x128xf32, #tpu.memory_space<vmem>>, vector<1x128xf32>
    tpu.vector_store %arg6[%c0_11, %c0_12], %12 {strides = array<i32>} : memref<1x128xf32, #tpu.memory_space<vmem>>, vector<1x128xf32>,
    return
  }
  func.func @transform_0(%arg0: i32) -> (i32, i32) {
    %c0_i32 = arith.constant 0 : i32
    %c0_i32_0 = arith.constant 0 : i32
    return %arg0, %c0_i32 : i32, i32
  }
  func.func @transform_1(%arg0: i32) -> (i32, i32) {
    %c0_i32 = arith.constant 0 : i32
    %c0_i32_0 = arith.constant 0 : i32
    %c0_i32_1 = arith.constant 0 : i32
    return %c0_i32, %c0_i32_0 : i32, i32
  }
  func.func @transform_2(%arg0: i32) -> (i32, i32) {
    %c0_i32 = arith.constant 0 : i32
    %c0_i32_0 = arith.constant 0 : i32
    %c0_i32_1 = arith.constant 0 : i32
    return %c0_i32, %c0_i32_0 : i32, i32
  }
  func.func @transform_3(%arg0: i32) -> (i32, i32) {
    %c0_i32 = arith.constant 0 : i32
    %c0_i32_0 = arith.constant 0 : i32
    %c0_i32_1 = arith.constant 0 : i32
    return %c0_i32, %c0_i32_0 : i32, i32
  }
  func.func @transform_4(%arg0: i32) -> (i32, i32) {
    %c0_i32 = arith.constant 0 : i32
    %c0_i32_0 = arith.constant 0 : i32
    %c0_i32_1 = arith.constant 0 : i32
    return %c0_i32, %c0_i32_0 : i32, i32
  }
  func.func @transform_5(%arg0: i32) -> (i32, i32) {
    %c0_i32 = arith.constant 0 : i32
    %c0_i32_0 = arith.constant 0 : i32
    return %c0_i32, %arg0 : i32, i32
  }
}

</mosaic_0001>

<bundles_post_ra>
// kernel: tpu_custom_call.1
= control target key start
LH: loop header
LB: loop body
LE: loop exit
PB: predicated region body
PF: predicated region fallthrough
CT: control target
= control target key end

     0   :  { %s664_s0 = inlined_call_operand.vmem [shape: f32[8,16], index: 0, kind: input, shape index: {}]   ;;  %s665_s1 = inlined_call_operand.vmem [shape: f32[32,16], index: 1, kind: input, shape index: {}]   ;;  %s666_s2 = inlined_call_operand.vmem [shape: f32[32,1], index: 2, kind: input, shape index: {}]   ;;  %s667_s3 = inlined_call_operand.vmem [shape: f32[1,32], index: 3, kind: input, shape index: {}]   ;;  %s668_s4 = inlined_call_operand.<no memory space> [shape: f32[1,1], index: 4, kind: input, shape index: {}]   ;;  %s669_s5 = inlined_call_operand.hbm [shape: f32[1,8], index: 5, kind: output, shape index: {}]  }
   0x1   :  { %v10_v0 = vstv %s668_s4 }
   0x2   :  { %11 = vst [vmem:[#allocation2] sm:$0x1] %v10_v0 }
   0x3   :  { %v27_v1 = vld [vmem:[%s664_s0] sm:$0xff]  ;;  %v28_v2 = vld [vmem:[%s664_s0 + $0x8] sm:$0xff]  ;;  %vm67_vm0 = vcmask 130048   ;;  %v29_v3 = vld [vmem:[%s664_s0 + $0x10] sm:$0xff]  ;;  %v497_v7 = vmov 0  }
   0x4   :  { %v412_v4 = vpack.c.bf16 %v28_v2, %v27_v1  ;;  %vm546_vm1 = vmpackc.low %vm67_vm0, %vm67_vm0  ;;  %v30_v6 = vld [vmem:[%s664_s0 + $0x18] sm:$0xff]  ;;  %471 = vset.pattern.permute.xlu0 %v497_v7  ;;  %472 = vset.pattern.permute.xlu1 %v497_v7  ;;  %v23_v9 = vld [vmem:[%s665_s1] sm:$0xff] }
   0x5   :  { %v418_v8 = vpack.c.bf16 %v30_v6, %v29_v3  ;;  %v31_v10 = vld [vmem:[%s664_s0 + $0x20] sm:$0xff]  ;;  %v32_v11 = vld [vmem:[%s664_s0 + $0x28] sm:$0xff]  ;;  %395 = vmatprep.mubr.msk.f32.mxu0 %vm67_vm0, %v23_v9  ;;  %v45_v13 = vld [vmem:[%s666_s2 + $0x10] sm:$0xff] }
   0x6   :  { %414 = vmatprep.subr.msk.bf16.mxu0 %vm546_vm1, %v412_v4  ;;  %v43_v12 = vld [vmem:[%s666_s2] sm:$0xff]  ;;  %59 = vperm.xlu1 %472, %v45_v13  }
   0x7   :  { %417 = vmatpush3.bf16.xpose.msk.msra.mxu0 %vm546_vm1, %v412_v4  ;;  %49 = vperm.xlu0 %471, %v43_v12  }
   0x8   :  { %420 = vmatprep.subr.msk.bf16.mxu0 %vm546_vm1, %v418_v8 }
   0x9   :  { %12 = vsyncpa [#allocation4], 0  ;;  %v424_v14 = vpack.c.bf16 %v32_v11, %v31_v10  ;;  %v44_v15 = vld [vmem:[%s666_s2 + $0x8] sm:$0xff]  ;;  %v46_v16 = vld [vmem:[%s666_s2 + $0x18] sm:$0xff]  ;;  %v498_v36 = vmov 0.0|0.0   ;;  %vm499_vm2 = vmmov 0   ;;  %v224_v57 = vlaneseq }
   0xa   :  { %v218_v17 = vld [vmem:[#allocation2] sm:$0x1]  ;;  %64 = vperm.xlu1 %472, %v46_v16   ;;  %v33_v18 = vld [vmem:[%s664_s0 + $0x30] sm:$0xff]  ;;  %v34_v19 = vld [vmem:[%s664_s0 + $0x38] sm:$0xff]  ;;  %460 = vmatprep.subr.bf16.mxu1 %v498_v36  ;;  %v500_v37 = vmov 0.0   ;;  %vm228_vm3 = vcmask 261120  }
   0xb   :  { %54 = vperm.xlu0 %471, %v44_v15   ;;  %v430_v20 = vpack.c.bf16 %v34_v19, %v33_v18  ;;  %v35_v21 = vld [vmem:[%s664_s0 + $0x40] sm:$0xff]  ;;  %v36_v22 = vld [vmem:[%s664_s0 + $0x48] sm:$0xff]  ;;  %v37_v24 = vld [vmem:[%s664_s0 + $0x50] sm:$0xff]  ;;  %409 = vmatprep.mubr.msk.f32.mxu1 %vm499_vm2, %v500_v37  ;;  %v225_v58 = vshrl.u32 %v224_v57, 7  ;;  %s501_s15 = smov [#allocation3]  }
   0xc   :  { %v436_v23 = vpack.c.bf16 %v36_v22, %v35_v21  ;;  %v38_v25 = vld [vmem:[%s664_s0 + $0x58] sm:$0xff]  ;;  %v39_v27 = vld [vmem:[%s664_s0 + $0x60] sm:$0xff]  ;;  %v40_v28 = vld [vmem:[%s664_s0 + $0x68] sm:$0xff]  ;;  %s309_s16 = sshll.u32 %s501_s15, 4  ;;  %s310_s16 = int_to_ptr.vmem [resolvable:$true] %s309_s16 }
   0xd   :  { %v442_v26 = vpack.c.bf16 %v38_v25, %v37_v24  ;;  %v448_v29 = vpack.c.bf16 %v40_v28, %v39_v27  ;;  %v41_v30 = vld [vmem:[%s664_s0 + $0x70] sm:$0xff]  ;;  %v42_v31 = vld [vmem:[%s664_s0 + $0x78] sm:$0xff]  ;;  %v24_v33 = vld [vmem:[%s665_s1 + $0x8] sm:$0xff]  ;;  %v226_v59 = vsub.s32 0, %v225_v58  ;;  %s473_s17 = scalar_lea.vmem %s310_s16, 16  ;;  %s477_s18 = scalar_lea.vmem %s310_s16, 32 }
   0xe   :  { %v454_v32 = vpack.c.bf16 %v42_v31, %v41_v30  ;;  %v25_v34 = vld [vmem:[%s665_s1 + $0x10] sm:$0xff]  ;;  %v26_v35 = vld [vmem:[%s665_s1 + $0x18] sm:$0xff]  ;;  %v217_v56 = vld [vmem:[%s667_s3] sm:$0x1]  ;;  %p474_p0 = scmp.ne.s32.totalorder %s310_s16, %s473_s17  ;;  %p478_p1 = scmp.lt.s32.totalorder %s310_s16, %s310_s16 }
   0xf   :  { %423 = vmatpush3.bf16.xpose.msk.msra.mxu0 %vm546_vm1, %v418_v8  ;;  %221 = vperm.xlu0 %471, %v218_v17   ;;  %p479_p2 = scmp.lt.s32.totalorder %s477_s18, %s473_s17 }
  0x10   :  { %426 = vmatprep.subr.msk.bf16.mxu0 %vm546_vm1, %v424_v14 }
  0x11   :  { %p480_p3 = por %p479_p2, %p478_p1 }
  0x13   :  { %p481_p4 = pnand %p480_p3, %p474_p0 }
  0x17   :  { %429 = vmatpush3.bf16.xpose.msk.msra.mxu0 %vm546_vm1, %v424_v14 }
  0x18   :  { %432 = vmatprep.subr.msk.bf16.mxu0 %vm546_vm1, %v430_v20 }
  0x1f   :  { %435 = vmatpush3.bf16.xpose.msk.msra.mxu0 %vm546_vm1, %v430_v20 }
  0x20   :  { %438 = vmatprep.subr.msk.bf16.mxu0 %vm546_vm1, %v436_v23 }
  0x27   :  { %441 = vmatpush3.bf16.xpose.msk.msra.mxu0 %vm546_vm1, %v436_v23 }
  0x28   :  { %444 = vmatprep.subr.msk.bf16.mxu0 %vm546_vm1, %v442_v26 }
  0x2f   :  { %447 = vmatpush3.bf16.xpose.msk.msra.mxu0 %vm546_vm1, %v442_v26 }
  0x30   :  { %450 = vmatprep.subr.msk.bf16.mxu0 %vm546_vm1, %v448_v29 }
  0x37   :  { %453 = vmatpush3.bf16.xpose.msk.msra.mxu0 %vm546_vm1, %v448_v29 }
  0x38   :  { %456 = vmatprep.subr.msk.bf16.mxu0 %vm546_vm1, %v454_v32 }
  0x3f   :  { %459 = vmatpush3.bf16.xpose.msk.msra.mxu0 %vm546_vm1, %v454_v32 }
  0x46   :  { %396 = vmatmul.mubr.msk.f32.vlgmr.msra.gmra.mrb[0].mxu0 %vm67_vm0, %v24_v33 }
  0x47   :  { %398 = vmatprep.mubr.msk.f32.mxu0 %vm67_vm0, %v25_v34 }
  0x4a   :  { %399 = vmatmul.mubr.msk.f32.gmra.mrb[2].mxu0 %vm67_vm0, %v26_v35 }
  0x85   :  { %v60_v39 = vpop.permute.xlu1 %59 }
  0x86   :  { %v50_v38 = vpop.permute.xlu0 %49 }
  0x89   :  { %v65_v46 = vpop.permute.xlu1 %64 }
  0x8a   :  { %v55_v40 = vpop.permute.xlu0 %54 }
  0x8e   :  { %v222_v60 = vpop.permute.xlu0 %221 }
  0x8f   :  { %v227_v61 = vrot.slane %v222_v60, %v226_v59 }
 0x119   :  { %v397_v41 = vpop.f32.mrb[0].mxu0 }
 0x11a   :  { %v200_v42 = vadd.f32 %v397_v41, %v55_v40  ;;  %v194_v43 = vpop.f32.mrb[1].mxu0 }
 0x11b   :  { %v195_v44 = vadd.f32 %v194_v43, %v50_v38 }
 0x11c   :  { %v214_v45 = vmax.f32 %v200_v42, 0.0 }
 0x11d   :  { %v213_v47 = vmax.f32 %v195_v44, 0.0  ;;  %v400_v48 = vpop.f32.mrb[2].mxu0 }
 0x11e   :  { %v210_v49 = vadd.f32 %v400_v48, %v65_v46  ;;  %v204_v50 = vpop.f32.mrb[3].mxu0 }
 0x11f   :  { %v205_v51 = vadd.f32 %v204_v50, %v60_v39  ;;  %v461_v52 = vpack.c.bf16 %v214_v45, %v213_v47 }
 0x120   :  { %v216_v53 = vmax.f32 %v210_v49, 0.0 }
 0x121   :  { %v215_v54 = vmax.f32 %v205_v51, 0.0  ;;  %462 = vmatpush3.bf16.msra.mxu1 %v461_v52 }
 0x122   :  { %463 = vmatprep.subr.bf16.mxu1 %v498_v36 }
 0x123   :  { %v464_v55 = vpack.c.bf16 %v216_v53, %v215_v54 }
 0x125   :  { %465 = vmatpush3.bf16.msra.mxu1 %v464_v55 }
 0x128   :  { %410 = vmatmul.mubr.msk.f32.vlgmr.msra.gmra.mrb[0].mxu1 %vm228_vm3, %v217_v56 }
 0x1fb   :  { %v298_v62 = vpop.f32.mrb[0].mxu1 }
 0x1fc   :  { %v299_v63 = vadd.f32 %v298_v62, %v227_v61  ;;  %v411_v0 = vpop.f32.mrb[1].mxu1 }
 0x1fe   :  { %302 = vst [vmem:[#allocation3] sm:$0x1] %v299_v63 }
 0x1ff   :  { %484 = shalt.err (!%p481_p4)
}
 0x200   :  { %s485_s2 = scalar_lea.hbm %s669_s5, 16 }
 0x201   :  { %p486_p5 = scmp.ne.s32.totalorder %s669_s5, %s485_s2  ;;  %p489_p6 = scmp.lt.u32.totalorder %s485_s2, %s669_s5 }
 0x203   :  { %p491_p7 = pnand %p489_p6, %p486_p5 }
 0x205   :  { %494 = shalt.err (!%p491_p7)
}
 0x206   :  { %312 = dma.vmem_to_hbm [thread:$0]  %s310_s16, 16, %s669_s5, [#allocation4]  }
 0x207   :  { %495 = dma.done.wait [#allocation4], 16  }
 0x208   :  { %496 = vsyncadd [#allocation4], 4294967280 }
 0x209   :  { %316 = vsyncpa [#allocation4], 1 }

</bundles_post_ra>
